<compile_context>
chip_gen: v7x
topology: tpu7x:2x2x1
jax: 0.10.0
libtpu: 0.0.40
codegen_flags: <defaults>
</compile_context>

<pallas_src>
import math
import functools

import jax
import jax.numpy as jnp
from jax.experimental import pallas as pl
from jax.experimental.pallas import tpu as pltpu

_LANE = 128  # TPU vreg lane width: output last dim should be a multiple of this.


# ----------------------------------------------------------------------------
# Kernels
# ----------------------------------------------------------------------------
def _linear_bias_kernel(x_ref, wt_ref, b_ref, o_ref, *, scale):
    # x_ref: (B, K)   wt_ref: (K, N)   b_ref: (1, N) (already bias*lr_mul, f32)
    wt = wt_ref[...]                      # big tensor: no up-cast, fed straight to the MXU
    x = x_ref[...].astype(wt.dtype)       # tiny (B, K) cast at the MXU operand boundary
    acc = jnp.dot(x, wt, preferred_element_type=jnp.float32)   # MXU, f32 accumulate
    # Scalar `scale` folded on the small (B, N) output, not the (K, N) weight.
    # Elementwise math stays in f32 (v5e VPU has no bf16).
    o_ref[...] = (acc * scale + b_ref[...]).astype(o_ref.dtype)


def _linear_nobias_kernel(x_ref, wt_ref, o_ref, *, scale):
    wt = wt_ref[...]
    x = x_ref[...].astype(wt.dtype)
    acc = jnp.dot(x, wt, preferred_element_type=jnp.float32)
    o_ref[...] = (acc * scale).astype(o_ref.dtype)


# ----------------------------------------------------------------------------
# Wrapper: out = scale * (x @ W^T) + bias*lr_mul, with W pre-transposed.
# Single full-extent block, one grid step (no N split -- see header comment).
# ----------------------------------------------------------------------------
def fused_equal_linear(x2, weight_t, bias_scaled=None, *, scale, out_dtype=None):
    """x2: (B, K); weight_t: (K, N) pre-transposed; bias_scaled: (N,) = bias*lr_mul or None."""
    B, K = x2.shape
    K2, N = weight_t.shape
    assert K == K2, (x2.shape, weight_t.shape)
    out_dtype = out_dtype or x2.dtype

    in_specs = [
        pl.BlockSpec((B, K), lambda i: (0, 0)),   # full-extent blocks (legal even if B < 8)
        pl.BlockSpec((K, N), lambda i: (0, 0)),   # pre-transposed weight (no XLU transpose)
    ]
    args = [x2, weight_t]
    bytes_accessed = (x2.size * x2.dtype.itemsize
                      + weight_t.size * weight_t.dtype.itemsize
                      + B * N * jnp.dtype(out_dtype).itemsize)

    if bias_scaled is not None:
        b2 = bias_scaled.reshape(1, N).astype(jnp.float32)
        in_specs.append(pl.BlockSpec((1, N), lambda i: (0, 0)))
        args.append(b2)
        bytes_accessed += b2.size * b2.dtype.itemsize
        kernel = functools.partial(_linear_bias_kernel, scale=float(scale))
    else:
        # No-bias path: no zeros bias is synthesized / DMA'd at all.
        kernel = functools.partial(_linear_nobias_kernel, scale=float(scale))

    # NOTE: if n_mod/out_dim ever grows so 2*K*N*itemsize approaches the scoped
    # VMEM default, bump pltpu.CompilerParams(vmem_limit_bytes=...) before
    # splitting N -- largest block / fewest grid steps is the biggest lever.
    return pl.pallas_call(
        kernel,
        out_shape=jax.ShapeDtypeStruct((B, N), out_dtype),
        grid=(1,),
        in_specs=in_specs,
        out_specs=pl.BlockSpec((B, N), lambda i: (0, 0)),
        cost_estimate=pl.CostEstimate(
            flops=2 * B * K * N,
            transcendentals=0,
            bytes_accessed=int(bytes_accessed)),
    )(*args)


# ----------------------------------------------------------------------------
# EqualLinear (single head): prep is hoisted so the per-call path is 1 kernel.
# ----------------------------------------------------------------------------
def prepare_equal_linear_params(weight, bias=None, *, lr_mul=1.0, activation=None,
                                weight_dtype=jnp.bfloat16, pad_out_to_lanes=True):
    """One-time parameter prep for EqualLinear (cache the result across forwards).

    weight: (out_dim, in_dim), bias: (out_dim,) or None.
    Pads out_dim up to a multiple of 128 so the kernel's output store is
    lane-dense (unmasked vst); the wrapper slices the padding back off.
    """
    if activation is not None:
        # PyTorch's EqualLinear activation branch uses fused_leaky_relu (bias added
        # inside the activation, sqrt(2) gain); CMDSR's Modulations never uses it.
        # TODO(synk): implement the fused_leaky_relu activation path if ever needed.
        raise NotImplementedError("EqualLinear activation path is not implemented")
    out_dim, in_dim = weight.shape
    scale = 1.0 / math.sqrt(in_dim) * lr_mul
    wt = jnp.transpose(weight)                                    # (K, N)
    b = (bias * lr_mul).astype(jnp.float32) if bias is not None else None
    n_pad = out_dim
    if pad_out_to_lanes and out_dim % _LANE != 0:
        n_pad = ((out_dim + _LANE - 1) // _LANE) * _LANE
        wt = jnp.pad(wt, ((0, 0), (0, n_pad - out_dim)))
        if b is not None:
            b = jnp.pad(b, (0, n_pad - out_dim))
    if weight_dtype is not None:
        # bf16 weight storage halves the dominant weight DMA; accumulation stays f32.
        wt = wt.astype(weight_dtype)
    return {"weight_t": wt, "bias_scaled": b, "scale": scale, "out_dim": out_dim}


def equal_linear_forward(x, params, *, out_dtype=None):
    """EqualLinear.forward with pre-prepared params: x (B, ...) -> (B, out_dim)."""
    B = x.shape[0]
    x2 = x.reshape(B, -1)                     # same as torch .view(B, -1)
    out = fused_equal_linear(x2, params["weight_t"], params["bias_scaled"],
                             scale=params["scale"], out_dtype=out_dtype)
    out_dim = params["out_dim"]
    if out.shape[1] != out_dim:
        out = out[:, :out_dim]                # strip lane padding
    return out


def equal_linear(x, weight, bias=None, *, lr_mul=1.0, activation=None,
                 weight_dtype=None):
    """Convenience EqualLinear.forward. Prefer prepare_equal_linear_params +
    equal_linear_forward so weight.T / bias*lr_mul / padding are not re-issued
    as XLA ops on every call."""
    params = prepare_equal_linear_params(weight, bias, lr_mul=lr_mul,
                                         activation=activation,
                                         weight_dtype=weight_dtype)
    return equal_linear_forward(x, params)


# ----------------------------------------------------------------------------
# Modulations.forward: all n_block*n_conv_each_block heads fused in ONE pallas_call.
# ----------------------------------------------------------------------------
def prepare_modulations_params(weights, biases, *, lr_mul=1.0,
                               weight_dtype=jnp.bfloat16):
    """One-time parameter prep (amortized across forward calls).

    weights: (n_mod, out_dim, in_dim)  -- each head's EqualLinear weight
    biases:  (n_mod, out_dim)
    Returns (weight_t, bias_scaled, scale), weight_t: (in_dim, n_mod*out_dim) lane-dense.
    Default weight storage is bf16 (MXU-native, halves the dominant weight DMA);
    pass weight_dtype=jnp.float32 (or None) for exact f32 numerics.
    """
    n_mod, out_dim, in_dim = weights.shape
    wt = jnp.transpose(weights.reshape(n_mod * out_dim, in_dim))   # (K, N)
    if weight_dtype is not None:
        wt = wt.astype(weight_dtype)
    b = (biases.reshape(n_mod * out_dim) * lr_mul).astype(jnp.float32)
    scale = 1.0 / math.sqrt(in_dim) * lr_mul
    return wt, b, scale


def modulations_forward(condition_feature, weight_t, bias_scaled, scale, *,
                        n_block, n_conv_each_block, sr_in_channel,
                        layout="torch"):
    """condition_feature: (task_size, condition_channel, h, w) with h == w == 1.

    layout="torch": returns (n_block, n_conv_each_block, task_size, 1, sr_in_channel, 1, 1),
        matching the PyTorch Modulations.forward output layout.
    layout="flat": returns (task_size, n_mod, sr_in_channel) straight from the kernel
        (skips the tiny trailing transpose when the consumer can take it directly).
    """
    task_size = condition_feature.shape[0]
    # permute(0,2,3,1).view(task_size, -1)  (h = w = 1 after ConditionNet's global avg-pool)
    x2 = jnp.transpose(condition_feature, (0, 2, 3, 1)).reshape(task_size, -1)
    out = fused_equal_linear(x2, weight_t, bias_scaled, scale=scale)  # (task, n_mod*out_dim)
    n_mod = n_block * n_conv_each_block
    if layout == "flat":
        return out.reshape(task_size, n_mod, sr_in_channel)
    out = out.reshape(task_size, n_mod, sr_in_channel)
    out = jnp.transpose(out, (1, 0, 2))                               # head-major, like torch.cat
    return out.reshape(n_block, n_conv_each_block, task_size, 1, sr_in_channel, 1, 1)


# ----------------------------------------------------------------------------
# Demo / correctness check
# ----------------------------------------------------------------------------
if __name__ == "__main__":
    key = jax.random.PRNGKey(0)
    k_x, k_w, k_w1 = jax.random.split(key, 3)

    # Small Modulations config consistent with CMDSR (conv_index='22'):
    #   condition_channel=128, sr_in_channel=64; small n_block / task_size.
    task_size = 2
    condition_channel = 128
    sr_in_channel = 64
    n_block, n_conv_each_block = 4, 2
    n_mod = n_block * n_conv_each_block          # 8 heads -> fused N = 512 (lane-dense)
    lr_mul = 1.0
    bias_init = 1.0                              # Modulations uses EqualLinear(..., bias_init=1)

    condition_feature = jax.random.normal(
        k_x, (task_size, condition_channel, 1, 1), dtype=jnp.float32)

    # EqualLinear.__init__: weight = randn(out, in) / lr_mul ; bias = full(out, bias_init)
    weights = jax.random.normal(
        k_w, (n_mod, sr_in_channel, condition_channel), dtype=jnp.float32) / lr_mul
    biases = jnp.full((n_mod, sr_in_channel), bias_init, dtype=jnp.float32)

    # --- fused Modulations forward, default bf16 weight storage -------------
    wt, b_scaled, scale = prepare_modulations_params(weights, biases, lr_mul=lr_mul)
    out = modulations_forward(condition_feature, wt, b_scaled, scale,
                              n_block=n_block, n_conv_each_block=n_conv_each_block,
                              sr_in_channel=sr_in_channel)
    out = jax.block_until_ready(out)
    assert out.shape == (n_block, n_conv_each_block, task_size, 1, sr_in_channel, 1, 1)

    x2 = jnp.transpose(condition_feature, (0, 2, 3, 1)).reshape(task_size, -1)

    # Tight check vs a reference that emulates the kernel's bf16 weight path.
    wt_bf = jnp.transpose(weights.reshape(n_mod * sr_in_channel, condition_channel)
                          ).astype(jnp.bfloat16)
    ref_bf = (jnp.dot(x2.astype(jnp.bfloat16), wt_bf,
                      preferred_element_type=jnp.float32) * scale
              + (biases.reshape(-1) * lr_mul)[None, :])
    ref_bf = jnp.transpose(ref_bf.reshape(task_size, n_mod, sr_in_channel), (1, 0, 2)
                           ).reshape(out.shape)
    err_bf = float(jnp.max(jnp.abs(out - ref_bf)))
    assert jnp.allclose(out, ref_bf, atol=2e-3, rtol=2e-3), err_bf

    # Loose check vs the exact f32 PyTorch-style math (bf16 weight quantization noise).
    ref_heads = [x2 @ (weights[m] * scale).T + biases[m] * lr_mul for m in range(n_mod)]
    ref_f32 = jnp.stack(ref_heads, 0).reshape(out.shape)
    err_f32 = float(jnp.max(jnp.abs(out - ref_f32)))
    assert jnp.allclose(out, ref_f32, atol=5e-2, rtol=5e-2), err_f32

    # Also verify the exact-f32 mode matches the PyTorch math tightly.
    wt32, b32, scale32 = prepare_modulations_params(weights, biases, lr_mul=lr_mul,
                                                    weight_dtype=jnp.float32)
    out32 = jax.block_until_ready(
        modulations_forward(condition_feature, wt32, b32, scale32,
                            n_block=n_block, n_conv_each_block=n_conv_each_block,
                            sr_in_channel=sr_in_channel))
    assert jnp.allclose(out32, ref_f32, atol=1e-4, rtol=1e-4), \
        float(jnp.max(jnp.abs(out32 - ref_f32)))

    # --- standalone EqualLinear (single head, out_dim=64 padded to 128 lanes) ---
    w1 = jax.random.normal(k_w1, (sr_in_channel, condition_channel), dtype=jnp.float32)
    b1 = jnp.zeros((sr_in_channel,), dtype=jnp.float32)
    p1 = prepare_equal_linear_params(w1, b1, lr_mul=lr_mul, activation=None,
                                     weight_dtype=jnp.float32)   # exact-f32 single-head check
    out1 = jax.block_until_ready(equal_linear_forward(x2, p1))
    ref1 = x2 @ (w1 * (1.0 / math.sqrt(condition_channel) * lr_mul)).T + b1 * lr_mul
    assert out1.shape == (task_size, sr_in_channel)
    assert jnp.allclose(out1, ref1, atol=1e-4, rtol=1e-4), \
        float(jnp.max(jnp.abs(out1 - ref1)))

    # Activation path must refuse rather than silently diverge from fused_leaky_relu.
    try:
        prepare_equal_linear_params(w1, b1, activation="fused_lrelu")
        raise AssertionError("expected NotImplementedError for activation path")
    except NotImplementedError:
        pass

    print("KERNEL_OK")
</pallas_src>

<mosaic_0001>
module attributes {stable_mosaic.version = 11 : i64} {
  func.func @_linear_bias_kernel(%arg0: i32, %arg1: memref<2x128xf32, #tpu.memory_space<vmem>>, %arg2: memref<128x512xbf16, #tpu.memory_space<vmem>>, %arg3: memref<1x512xf32, #tpu.memory_space<vmem>>, %arg4: memref<2x512xf32, #tpu.memory_space<vmem>>) attributes {dimension_semantics = [#tpu.dimension_semantics<arbitrary>], iteration_bounds = array<i64: 1>, scalar_prefetch = 0 : i64, scratch_operands = 0 : i64, tpu.core_type = #tpu.core_type<tc>, window_params = [{pipeline_mode = #tpu.pipeline_mode<synchronous>, transform_indices = @transform_0, window_bounds = array<i64: 2, 128>}, {pipeline_mode = #tpu.pipeline_mode<synchronous>, transform_indices = @transform_1, window_bounds = array<i64: 128, 512>}, {pipeline_mode = #tpu.pipeline_mode<synchronous>, transform_indices = @transform_2, window_bounds = array<i64: 1, 512>}, {pipeline_mode = #tpu.pipeline_mode<synchronous>, transform_indices = @transform_3, window_bounds = array<i64: 2, 512>}]} {
    %c0 = arith.constant 0 : index
    %c0_0 = arith.constant 0 : index
    %0 = vector.load %arg2[%c0, %c0_0] : memref<128x512xbf16, #tpu.memory_space<vmem>>, vector<128x512xbf16>
    %c0_1 = arith.constant 0 : index
    %c0_2 = arith.constant 0 : index
    %1 = vector.load %arg1[%c0_1, %c0_2] : memref<2x128xf32, #tpu.memory_space<vmem>>, vector<2x128xf32>
    %2 = arith.truncf %1 : vector<2x128xf32> to vector<2x128xbf16>
    %cst = arith.constant dense<0.000000e+00> : vector<2x512xf32>
    %3 = tpu.matmul %2, %0, %cst {dimension_numbers = #tpu.dot_dimension_numbers<[1], [0], [0], [1], [0, 0, 1, 1], [], []>} : vector<2x128xbf16>, vector<128x512xbf16>, vector<2x512xf32> -> vector<2x512xf32>
    %cst_3 = arith.constant 0.0883883461 : f32
    %4 = vector.broadcast %cst_3 : f32 to vector<2x512xf32>
    %5 = arith.mulf %3, %4 : vector<2x512xf32>
    %c0_4 = arith.constant 0 : index
    %c0_5 = arith.constant 0 : index
    %6 = vector.load %arg3[%c0_4, %c0_5] : memref<1x512xf32, #tpu.memory_space<vmem>>, vector<1x512xf32>
    %7 = vector.broadcast %6 : vector<1x512xf32> to vector<2x512xf32>
    %8 = arith.addf %5, %7 : vector<2x512xf32>
    %c0_6 = arith.constant 0 : index
    %c0_7 = arith.constant 0 : index
    %9 = vector.load %arg4[%c0_6, %c0_7] : memref<2x512xf32, #tpu.memory_space<vmem>>, vector<2x512xf32>
    tpu.vector_store %arg4[%c0_6, %c0_7], %8 {strides = array<i32>} : memref<2x512xf32, #tpu.memory_space<vmem>>, vector<2x512xf32>,
    return
  }
  func.func @transform_0(%arg0: i32) -> (i32, i32) {
    %c0_i32 = arith.constant 0 : i32
    %c0_i32_0 = arith.constant 0 : i32
    %c0_i32_1 = arith.constant 0 : i32
    return %c0_i32, %c0_i32_0 : i32, i32
  }
  func.func @transform_1(%arg0: i32) -> (i32, i32) {
    %c0_i32 = arith.constant 0 : i32
    %c0_i32_0 = arith.constant 0 : i32
    %c0_i32_1 = arith.constant 0 : i32
    return %c0_i32, %c0_i32_0 : i32, i32
  }
  func.func @transform_2(%arg0: i32) -> (i32, i32) {
    %c0_i32 = arith.constant 0 : i32
    %c0_i32_0 = arith.constant 0 : i32
    %c0_i32_1 = arith.constant 0 : i32
    return %c0_i32, %c0_i32_0 : i32, i32
  }
  func.func @transform_3(%arg0: i32) -> (i32, i32) {
    %c0_i32 = arith.constant 0 : i32
    %c0_i32_0 = arith.constant 0 : i32
    %c0_i32_1 = arith.constant 0 : i32
    return %c0_i32, %c0_i32_0 : i32, i32
  }
}

</mosaic_0001>

<bundles_post_ra>
// kernel: tpu_custom_call.1
= control target key start
LH: loop header
LB: loop body
LE: loop exit
PB: predicated region body
PF: predicated region fallthrough
CT: control target
= control target key end

     0   :  { %8 = vsyncpa [#allocation3], 0  ;;  %s619_s0 = inlined_call_operand.hbm [shape: f32[2,128], index: 0, kind: input, shape index: {}]   ;;  %s620_s1 = inlined_call_operand.hbm [shape: bf16[128,512], index: 1, kind: input, shape index: {}]   ;;  %s621_s2 = inlined_call_operand.vmem [shape: f32[1,512], index: 2, kind: input, shape index: {}]   ;;  %s622_s3 = inlined_call_operand.hbm [shape: f32[2,512], index: 3, kind: output, shape index: {}]  }
   0x1   :  { %9 = vsyncpa [#allocation6], 0 }
   0x2   :  { %10 = vsyncpa [#allocation4], 0  ;;  %s546_s12 = smov [#allocation2]   ;;  %s547_s14 = smov [#allocation5]  }
   0x3   :  { %s17_s13 = sshll.u32 %s546_s12, 4  ;;  %s26_s15 = sshll.u32 %s547_s14, 4  ;;  %s18_s13 = int_to_ptr.vmem [resolvable:$true] %s17_s13  ;;  %s573_s15 = int_to_ptr.vmem [resolvable:$true] %s26_s15 }
   0x4   :  { %s474_s18 = scalar_lea.hbm %s619_s0, 32 }
   0x5   :  { %p475_p0 = scmp.ne.s32.totalorder %s619_s0, %s474_s18  ;;  %p478_p1 = scmp.lt.u32.totalorder %s474_s18, %s619_s0 }
   0x7   :  { %p480_p2 = pnand %p478_p1, %p475_p0 }
   0x9   :  { %483 = shalt.err (!%p480_p2)
}
   0xa   :  { %s484_s23 = scalar_lea.vmem %s18_s13, 32  ;;  %p489_p4 = scmp.lt.s32.totalorder %s18_s13, %s18_s13 }
   0xb   :  { %p485_p3 = scmp.ne.s32.totalorder %s18_s13, %s484_s23  ;;  %p490_p5 = scmp.lt.s32.totalorder %s484_s23, %s484_s23 }
   0xd   :  { %p491_p6 = por %p490_p5, %p489_p4 }
   0xf   :  { %p492_p7 = pnand %p491_p6, %p485_p3 }
  0x11   :  { %495 = shalt.err (!%p492_p7)
}
  0x12   :  { %20 = dma.hbm_to_vmem [thread:$0]  %s619_s0, 32, %s18_s13, [#allocation3]  }
  0x13   :  { %s496_s28 = scalar_lea.hbm %s620_s1, 4096 }
  0x14   :  { %p497_p8 = scmp.ne.s32.totalorder %s620_s1, %s496_s28  ;;  %p500_p9 = scmp.lt.u32.totalorder %s496_s28, %s620_s1 }
  0x16   :  { %p502_p10 = pnand %p500_p9, %p497_p8 }
  0x18   :  { %505 = shalt.err (!%p502_p10)
}
  0x19   :  { %s506_s6 = scalar_lea.vmem %s573_s15, 4096  ;;  %p511_p12 = scmp.lt.s32.totalorder %s573_s15, %s573_s15 }
  0x1a   :  { %p507_p11 = scmp.ne.s32.totalorder %s573_s15, %s506_s6  ;;  %p512_p13 = scmp.lt.s32.totalorder %s506_s6, %s506_s6 }
  0x1c   :  { %p513_p0 = por %p512_p13, %p511_p12 }
  0x1e   :  { %p514_p1 = pnand %p513_p0, %p507_p11 }
  0x20   :  { %517 = shalt.err (!%p514_p1)
}
  0x21   :  { %s548_s0 = smov 256   ;;  %s549_s7 = smov 16  }
  0x22   :  { %32 = dma.hbm_to_vmem [thread:$0]  %s620_s1, 4096, %s573_s15, [#allocation6], %s548_s0, %s548_s0, %s549_s7  }
  0x23   :  { %540 = dma.done.wait [#allocation3], 32  }
  0x24   :  { %541 = vsyncadd [#allocation3], 4294967264 }
  0x25   :  { %542 = dma.done.wait [#allocation6], 4096  }
  0x26   :  { %543 = vsyncadd [#allocation6], 4294963200  ;;  %v550_v0 = vmov 0   ;;  %v426_v1 = vld [vmem:[#allocation5 + $0x4] ss:$16 sps:$4 sm:$0xff]   ;;  %v324_v35 = vlaneseq }
  0x27   :  { %268 = vmatprep.mubr.bf16.mxu0 %v550_v0  ;;  %309 = vmatprep.mubr.bf16.mxu1 %v550_v0  ;;  %v428_v2 = vld [vmem:[#allocation5 + $0xc] ss:$16 sps:$4 sm:$0xff]   ;;  %v430_v3 = vld [vmem:[#allocation5] ss:$16 sps:$4 sm:$0xff]   ;;  %v431_v4 = vld [vmem:[#allocation5 + $0x8] ss:$16 sps:$4 sm:$0xff]  }
  0x28   :  { %236 = vmatprep.subr.bf16.mxu0 %v426_v1  ;;  %277 = vmatprep.subr.bf16.mxu1 %v428_v2  ;;  %v432_v5 = vld [vmem:[#allocation5 + $0x24] ss:$16 sps:$4 sm:$0xff]   ;;  %v434_v6 = vld [vmem:[#allocation5 + $0x2c] ss:$16 sps:$4 sm:$0xff]   ;;  %v436_v7 = vld [vmem:[#allocation5 + $0x20] ss:$16 sps:$4 sm:$0xff]  }
  0x29   :  { %237 = vmatpush1.bf16.msra.mxu0 %v430_v3  ;;  %278 = vmatpush1.bf16.msra.mxu1 %v431_v4  ;;  %v437_v8 = vld [vmem:[#allocation5 + $0x28] ss:$16 sps:$4 sm:$0xff]   ;;  %v438_v9 = vld [vmem:[#allocation5 + $0x44] ss:$16 sps:$4 sm:$0xff]   ;;  %v440_v10 = vld [vmem:[#allocation5 + $0x4c] ss:$16 sps:$4 sm:$0xff]  }
  0x2a   :  { %238 = vmatprep.subr.bf16.mxu0 %v432_v5  ;;  %279 = vmatprep.subr.bf16.mxu1 %v434_v6  ;;  %v442_v11 = vld [vmem:[#allocation5 + $0x40] ss:$16 sps:$4 sm:$0xff]   ;;  %v443_v12 = vld [vmem:[#allocation5 + $0x48] ss:$16 sps:$4 sm:$0xff]   ;;  %v444_v13 = vld [vmem:[#allocation5 + $0x64] ss:$16 sps:$4 sm:$0xff]  }
  0x2b   :  { %v446_v14 = vld [vmem:[#allocation5 + $0x6c] ss:$16 sps:$4 sm:$0xff]   ;;  %v448_v15 = vld [vmem:[#allocation5 + $0x60] ss:$16 sps:$4 sm:$0xff]   ;;  %v449_v16 = vld [vmem:[#allocation5 + $0x68] ss:$16 sps:$4 sm:$0xff]  }
  0x2c   :  { %v450_v17 = vld [vmem:[#allocation5 + $0x84] ss:$16 sps:$4 sm:$0xff]   ;;  %v452_v18 = vld [vmem:[#allocation5 + $0x8c] ss:$16 sps:$4 sm:$0xff]   ;;  %v454_v19 = vld [vmem:[#allocation5 + $0x80] ss:$16 sps:$4 sm:$0xff]  }
  0x2d   :  { %239 = vmatpush1.bf16.msra.mxu0 %v436_v7  ;;  %280 = vmatpush1.bf16.msra.mxu1 %v437_v8  ;;  %v455_v20 = vld [vmem:[#allocation5 + $0x88] ss:$16 sps:$4 sm:$0xff]   ;;  %v456_v21 = vld [vmem:[#allocation5 + $0xa4] ss:$16 sps:$4 sm:$0xff]   ;;  %v458_v22 = vld [vmem:[#allocation5 + $0xac] ss:$16 sps:$4 sm:$0xff]  }
  0x2e   :  { %240 = vmatprep.subr.bf16.mxu0 %v438_v9  ;;  %281 = vmatprep.subr.bf16.mxu1 %v440_v10  ;;  %v460_v23 = vld [vmem:[#allocation5 + $0xa0] ss:$16 sps:$4 sm:$0xff]   ;;  %v461_v24 = vld [vmem:[#allocation5 + $0xa8] ss:$16 sps:$4 sm:$0xff]   ;;  %v462_v25 = vld [vmem:[#allocation5 + $0xc4] ss:$16 sps:$4 sm:$0xff]  }
  0x2f   :  { %v464_v26 = vld [vmem:[#allocation5 + $0xcc] ss:$16 sps:$4 sm:$0xff]   ;;  %v466_v27 = vld [vmem:[#allocation5 + $0xc0] ss:$16 sps:$4 sm:$0xff]   ;;  %v467_v28 = vld [vmem:[#allocation5 + $0xc8] ss:$16 sps:$4 sm:$0xff]  }
  0x30   :  { %v468_v29 = vld [vmem:[#allocation5 + $0xe4] ss:$16 sps:$4 sm:$0xff]   ;;  %v470_v30 = vld [vmem:[#allocation5 + $0xec] ss:$16 sps:$4 sm:$0xff]   ;;  %v472_v31 = vld [vmem:[#allocation5 + $0xe0] ss:$16 sps:$4 sm:$0xff]  }
  0x31   :  { %241 = vmatpush1.bf16.msra.mxu0 %v442_v11  ;;  %282 = vmatpush1.bf16.msra.mxu1 %v443_v12  ;;  %v473_v32 = vld [vmem:[#allocation5 + $0xe8] ss:$16 sps:$4 sm:$0xff]   ;;  %v74_v33 = vld [vmem:[#allocation2] sm:$0x3]  ;;  %v325_v36 = vshrl.u32 %v324_v35, 7 }
  0x32   :  { %242 = vmatprep.subr.bf16.mxu0 %v444_v13  ;;  %283 = vmatprep.subr.bf16.mxu1 %v446_v14  ;;  %v75_v34 = vpack.c.bf16 %v74_v33, %v74_v33  ;;  %v322_v39 = vld [vmem:[%s621_s2] sm:$0xf]  ;;  %v551_v42 = vmov 1983009808   ;;  %s552_s2 = smov [#allocation7]  }
  0x33   :  { %v326_v37 = vsub.s32 0, %v325_v36  ;;  %v334_v38 = vsub.s32 2, %v325_v36  ;;  %v330_v40 = vsub.s32 1, %v325_v36  ;;  %v338_v41 = vsub.s32 3, %v325_v36  ;;  %s377_s11 = sshll.u32 %s552_s2, 4  ;;  %s378_s11 = int_to_ptr.vmem [resolvable:$true] %s377_s11 }
  0x34   :  { %v355_v43 = vunpack.c.l.s4 %v551_v42  ;;  %s518_s12 = scalar_lea.vmem %s378_s11, 128  ;;  %p523_p3 = scmp.lt.s32.totalorder %s378_s11, %s378_s11 }
  0x35   :  { %243 = vmatpush1.bf16.msra.mxu0 %v448_v15  ;;  %284 = vmatpush1.bf16.msra.mxu1 %v449_v16  ;;  %v327_v44 = vrot.slane %v322_v39, %v326_v37  ;;  %v335_v45 = vrot.slane %v322_v39, %v334_v38  ;;  %v331_v48 = vrot.slane %v322_v39, %v330_v40  ;;  %p519_p2 = scmp.ne.s32.totalorder %s378_s11, %s518_s12  ;;  %p524_p4 = scmp.lt.s32.totalorder %s518_s12, %s518_s12 }
  0x36   :  { %244 = vmatprep.subr.bf16.mxu0 %v450_v17  ;;  %285 = vmatprep.subr.bf16.mxu1 %v452_v18  ;;  %v339_v49 = vrot.slane %v322_v39, %v338_v41  ;;  %v356_v50 = vunpack.c.0.s8 %v355_v43 }
  0x37   :  { %p525_p5 = por %p524_p4, %p523_p3 }
  0x38   :  { %v359_v1 = vsub.s32 %v356_v50, %v325_v36 }
  0x39   :  { %245 = vmatpush1.bf16.msra.mxu0 %v454_v19  ;;  %286 = vmatpush1.bf16.msra.mxu1 %v455_v20  ;;  %p526_p6 = pnand %p525_p5, %p519_p2 }
  0x3a   :  { %246 = vmatprep.subr.bf16.mxu0 %v456_v21  ;;  %287 = vmatprep.subr.bf16.mxu1 %v458_v22 }
  0x3d   :  { %247 = vmatpush1.bf16.msra.mxu0 %v460_v23  ;;  %288 = vmatpush1.bf16.msra.mxu1 %v461_v24 }
  0x3e   :  { %248 = vmatprep.subr.bf16.mxu0 %v462_v25  ;;  %289 = vmatprep.subr.bf16.mxu1 %v464_v26 }
  0x41   :  { %249 = vmatpush1.bf16.msra.mxu0 %v466_v27  ;;  %290 = vmatpush1.bf16.msra.mxu1 %v467_v28 }
  0x42   :  { %250 = vmatprep.subr.bf16.mxu0 %v468_v29  ;;  %291 = vmatprep.subr.bf16.mxu1 %v470_v30 }
  0x45   :  { %251 = vmatpush1.bf16.msra.mxu0 %v472_v31  ;;  %292 = vmatpush1.bf16.msra.mxu1 %v473_v32 }
  0x48   :  { %269 = vmatmul.mubr.bf16.vlgmr.msra.gmra.mrb[0].mxu0 %v75_v34  ;;  %310 = vmatmul.mubr.bf16.vlgmr.msra.gmra.mrb[0].mxu1 %v75_v34 }
 0x11b   :  { %v270_v46 = vpop.f32.mrb[0].mxu0  ;;  %v311_v47 = vpop.f32.mrb[0].mxu1 }
 0x11c   :  { %v318_v51 = vmul.f32 0.088388346, %v270_v46  ;;  %v320_v52 = vmul.f32 0.088388346, %v311_v47  ;;  %v272_v53 = vpop.f32.mrb[1].mxu0  ;;  %v313_v54 = vpop.f32.mrb[1].mxu1 }
 0x11d   :  { %v319_v55 = vmul.f32 0.088388346, %v272_v53  ;;  %v321_v56 = vmul.f32 0.088388346, %v313_v54  ;;  %v274_v57 = vpop.f32.mrb[2].mxu0  ;;  %v315_v58 = vpop.f32.mrb[2].mxu1 }
 0x11e   :  { %v344_v59 = vadd.f32 %v327_v44, %v318_v51  ;;  %v346_v60 = vadd.f32 %v335_v45, %v320_v52  ;;  %v275_v61 = vpop.f32.mrb[3].mxu0  ;;  %v316_v62 = vpop.f32.mrb[3].mxu1 }
 0x11f   :  { %v345_v63 = vadd.f32 %v331_v48, %v319_v55  ;;  %v347_v0 = vadd.f32 %v339_v49, %v321_v56 }
 0x121   :  { %v352_v2 = vcombine.low %v344_v59, %v345_v63  ;;  %v353_v3 = vcombine.low %v346_v60, %v347_v0 }
 0x123   :  { %v360_v4 = vrot.slane %v352_v2, %v359_v1  ;;  %v367_v5 = vrot.slane %v353_v3, %v359_v1 }
 0x125   :  { %v368_v6 = vcombine.low %v360_v4, %v367_v5 }
 0x127   :  { %370 = vst [vmem:[#allocation7] sm:$0xff] %v368_v6 }
 0x128   :  { %529 = shalt.err (!%p526_p6)
}
 0x129   :  { %s530_s15 = scalar_lea.hbm %s622_s3, 128 }
 0x12a   :  { %p531_p7 = scmp.ne.s32.totalorder %s622_s3, %s530_s15  ;;  %p534_p8 = scmp.lt.u32.totalorder %s530_s15, %s622_s3 }
 0x12c   :  { %p536_p9 = pnand %p534_p8, %p531_p7 }
 0x12e   :  { %539 = shalt.err (!%p536_p9)
}
 0x12f   :  { %380 = dma.vmem_to_hbm [thread:$0]  %s378_s11, 128, %s622_s3, [#allocation4]  }
 0x130   :  { %544 = dma.done.wait [#allocation4], 128  }
 0x131   :  { %545 = vsyncadd [#allocation4], 4294967168 }
 0x132   :  { %384 = vsyncpa [#allocation3], 1 }
 0x133   :  { %385 = vsyncpa [#allocation6], 1 }
 0x134   :  { %386 = vsyncpa [#allocation4], 1 }

</bundles_post_ra>
